<compile_context>
chip_gen: v5e
topology: v5e:2x2
jax: 0.10.0
libtpu: 0.0.40
codegen_flags: <defaults>
</compile_context>

<pallas_src>
import jax
import jax.numpy as jnp
from jax import lax
from jax.experimental import pallas as pl
from jax.experimental.pallas import tpu as pltpu


# -----------------------------------------------------------------------------
# Pass 1: h_pre = fc1(x); accumulate BatchNorm batch sum / sum-of-squares.
# Grid axis = row tiles ("arbitrary": stats outputs are revisited accumulators).
# -----------------------------------------------------------------------------
def _fc1_stats_kernel(x_ref, w1_ref, b1_ref, hpre_ref, ssum_ref, ssq_ref):
    hp = jnp.dot(x_ref[...], w1_ref[...],
                 preferred_element_type=jnp.float32) + b1_ref[...]
    hpre_ref[...] = hp

    # Column sums via MXU ones-row matmul (keeps the XLU free).
    ones_row = jnp.ones((1, hp.shape[0]), jnp.float32)
    t_sum = jnp.dot(ones_row, hp, preferred_element_type=jnp.float32)
    t_sq = jnp.dot(ones_row, hp * hp, preferred_element_type=jnp.float32)

    @pl.when(pl.program_id(0) == 0)
    def _():
        ssum_ref[...] = jnp.zeros_like(ssum_ref)
        ssq_ref[...] = jnp.zeros_like(ssq_ref)

    ssum_ref[...] += t_sum
    ssq_ref[...] += t_sq


# -----------------------------------------------------------------------------
# Pass 2: per-segment sums & counts of h = relu(BN(h_pre)) for both index sets.
# One-hot built in-kernel from the int32 index column; sums/counts via MXU.
# -----------------------------------------------------------------------------
def _seg_pool_kernel(hpre_ref, aidx_ref, eidx_ref, scale_ref, shift_ref,
                     sum_a_ref, cnt_a_ref, sum_e_ref, cnt_e_ref):
    h = jnp.maximum(hpre_ref[...] * scale_ref[...] + shift_ref[...], 0.0)
    t = h.shape[0]
    ones_row = jnp.ones((1, t), jnp.float32)
    first = pl.program_id(0) == 0

    def accumulate(idx_col, sum_ref, cnt_ref):
        s = sum_ref.shape[0]
        oh = (idx_col == lax.broadcasted_iota(jnp.int32, (t, s), 1)
              ).astype(jnp.float32)                                   # [T, S]
        seg_sum = lax.dot_general(oh, h, (((0,), (0,)), ((), ())),
                                  preferred_element_type=jnp.float32)  # [S, n_ae]
        seg_cnt = jnp.dot(ones_row, oh,
                          preferred_element_type=jnp.float32)          # [1, S]

        @pl.when(first)
        def _():
            sum_ref[...] = jnp.zeros_like(sum_ref)
            cnt_ref[...] = jnp.zeros_like(cnt_ref)

        sum_ref[...] += seg_sum
        cnt_ref[...] += seg_cnt

    accumulate(aidx_ref[...], sum_a_ref, cnt_a_ref)
    accumulate(eidx_ref[...], sum_e_ref, cnt_e_ref)


# -----------------------------------------------------------------------------
# Pass 3: gather-back pooled means + fused fc2/fc3 into one lane-dense output.
# out[:, 0:n_ae]  = relu(fc2([h, pool_atom, x_dist]))
# out[:, n_ae:2n] = relu(fc3([h, pool_ele,  x_dist]))
# realized as h@Wh + x_dist@Wd + p_atom@Wpa + p_ele@Wpe + b  (no concats).
# -----------------------------------------------------------------------------
def _fused_out_kernel(hpre_ref, xd_ref, aidx_ref, eidx_ref, scale_ref, shift_ref,
                      sma_ref, sme_ref, wh_ref, wd_ref, wpa_ref, wpe_ref, b_ref,
                      out_ref):
    h = jnp.maximum(hpre_ref[...] * scale_ref[...] + shift_ref[...], 0.0)
    t = h.shape[0]
    sa = sma_ref.shape[0]
    se = sme_ref.shape[0]

    oh_a = (aidx_ref[...] == lax.broadcasted_iota(jnp.int32, (t, sa), 1)
            ).astype(jnp.float32)
    oh_e = (eidx_ref[...] == lax.broadcasted_iota(jnp.int32, (t, se), 1)
            ).astype(jnp.float32)
    p_a = jnp.dot(oh_a, sma_ref[...], preferred_element_type=jnp.float32)
    p_e = jnp.dot(oh_e, sme_ref[...], preferred_element_type=jnp.float32)

    acc = jnp.dot(h, wh_ref[...], preferred_element_type=jnp.float32)
    acc = acc + jnp.dot(xd_ref[...], wd_ref[...], preferred_element_type=jnp.float32)
    acc = acc + jnp.dot(p_a, wpa_ref[...], preferred_element_type=jnp.float32)
    acc = acc + jnp.dot(p_e, wpe_ref[...], preferred_element_type=jnp.float32)
    acc = acc + b_ref[...]
    out_ref[...] = jnp.maximum(acc, 0.0)


# -----------------------------------------------------------------------------
# Wrapper
# -----------------------------------------------------------------------------
def _pick_block_rows(n, cap=512):
    cap = min(cap, n)
    bt = cap - (cap % 8)
    while bt >= 8:
        if n % bt == 0:
            return bt
        bt -= 8
    return n  # single tile fallback (block == full array dim is always legal)


def dist_layer(x, atom_idx, ele_idx, params, *, n_ae, n_de,
               n_seg_atom, n_seg_ele, eps=1e-5, block_rows=None):
    n, din = x.shape
    assert din == 2 * n_ae + n_de
    w1, b1, w2, b2, w3, b3, gamma, beta = params
    f32 = jnp.float32

    bt = block_rows if block_rows is not None else _pick_block_rows(n)
    assert n % bt == 0, "block_rows must divide N"
    n_tiles = n // bt

    x = x.astype(f32)
    aidx = atom_idx.reshape(n, 1).astype(jnp.int32)
    eidx = ele_idx.reshape(n, 1).astype(jnp.int32)
    x_dist = x[:, 2 * n_ae:]          # wrapper-side slice (free in XLA)

    # fc1 weight pre-transposed to [Din, n_ae]
    w1t = w1.T.astype(f32)
    b1r = b1.reshape(1, n_ae).astype(f32)

    # Fused fc2/fc3 weights, zero-padded to a 128-wide lane-dense output slab.
    out_pad = ((2 * n_ae + 127) // 128) * 128
    w2t = w2.T.astype(f32)            # [Din, n_ae], rows: [h | pool | x_dist]
    w3t = w3.T.astype(f32)
    wh = jnp.zeros((n_ae, out_pad), f32)
    wh = wh.at[:, :n_ae].set(w2t[:n_ae, :]).at[:, n_ae:2 * n_ae].set(w3t[:n_ae, :])
    wpa = jnp.zeros((n_ae, out_pad), f32).at[:, :n_ae].set(w2t[n_ae:2 * n_ae, :])
    wpe = jnp.zeros((n_ae, out_pad), f32).at[:, n_ae:2 * n_ae].set(w3t[n_ae:2 * n_ae, :])
    wd = jnp.zeros((n_de, out_pad), f32)
    wd = wd.at[:, :n_ae].set(w2t[2 * n_ae:, :]).at[:, n_ae:2 * n_ae].set(w3t[2 * n_ae:, :])
    b_out = jnp.zeros((1, out_pad), f32)
    b_out = b_out.at[0, :n_ae].set(b2.astype(f32)).at[0, n_ae:2 * n_ae].set(b3.astype(f32))

    vmem_limit = 32 * 1024 * 1024
    cparams_red = pltpu.CompilerParams(dimension_semantics=("arbitrary",),
                                       vmem_limit_bytes=vmem_limit)
    cparams_par = pltpu.CompilerParams(dimension_semantics=("parallel",),
                                       vmem_limit_bytes=vmem_limit)

    def row_spec(cols):
        return pl.BlockSpec((bt, cols), lambda i: (i, 0))

    def full_spec(shape):
        return pl.BlockSpec(shape, lambda i, _nd=len(shape): (0,) * _nd)

    # ---- pass 1: fc1 + BN partial sums ------------------------------------
    hpre, ssum, ssq = pl.pallas_call(
        _fc1_stats_kernel,
        grid=(n_tiles,),
        in_specs=[row_spec(din), full_spec((din, n_ae)), full_spec((1, n_ae))],
        out_specs=(row_spec(n_ae), full_spec((1, n_ae)), full_spec((1, n_ae))),
        out_shape=(jax.ShapeDtypeStruct((n, n_ae), f32),
                   jax.ShapeDtypeStruct((1, n_ae), f32),
                   jax.ShapeDtypeStruct((1, n_ae), f32)),
        compiler_params=cparams_red,
    )(x, w1t, b1r)

    # Tiny [1, n_ae] glue: fold training-mode BN (biased batch var) into
    # a per-feature scale/shift.
    # TODO(synk): BatchNorm1d running_mean/var buffer updates (training-time
    # side effect) are not emitted; only the forward normalization is computed.
    mu = ssum / n
    var = jnp.maximum(ssq / n - mu * mu, 0.0)
    scale = gamma.reshape(1, n_ae).astype(f32) * lax.rsqrt(var + eps)
    shift = beta.reshape(1, n_ae).astype(f32) - mu * scale

    # ---- pass 2: per-segment sums / counts ---------------------------------
    sum_a, cnt_a, sum_e, cnt_e = pl.pallas_call(
        _seg_pool_kernel,
        grid=(n_tiles,),
        in_specs=[row_spec(n_ae), row_spec(1), row_spec(1),
                  full_spec((1, n_ae)), full_spec((1, n_ae))],
        out_specs=(full_spec((n_seg_atom, n_ae)), full_spec((1, n_seg_atom)),
                   full_spec((n_seg_ele, n_ae)), full_spec((1, n_seg_ele))),
        out_shape=(jax.ShapeDtypeStruct((n_seg_atom, n_ae), f32),
                   jax.ShapeDtypeStruct((1, n_seg_atom), f32),
                   jax.ShapeDtypeStruct((n_seg_ele, n_ae), f32),
                   jax.ShapeDtypeStruct((1, n_seg_ele), f32)),
        compiler_params=cparams_red,
    )(hpre, aidx, eidx, scale, shift)

    seg_mean_a = sum_a / jnp.maximum(cnt_a.reshape(n_seg_atom, 1), 1.0)
    seg_mean_e = sum_e / jnp.maximum(cnt_e.reshape(n_seg_ele, 1), 1.0)

    # ---- pass 3: gather-back + fused fc2/fc3, lane-dense padded output -----
    out_padded = pl.pallas_call(
        _fused_out_kernel,
        grid=(n_tiles,),
        in_specs=[row_spec(n_ae), row_spec(n_de), row_spec(1), row_spec(1),
                  full_spec((1, n_ae)), full_spec((1, n_ae)),
                  full_spec((n_seg_atom, n_ae)), full_spec((n_seg_ele, n_ae)),
                  full_spec((n_ae, out_pad)), full_spec((n_de, out_pad)),
                  full_spec((n_ae, out_pad)), full_spec((n_ae, out_pad)),
                  full_spec((1, out_pad))],
        out_specs=row_spec(out_pad),
        out_shape=jax.ShapeDtypeStruct((n, out_pad), f32),
        compiler_params=cparams_par,
    )(hpre, x_dist, aidx, eidx, scale, shift,
      seg_mean_a, seg_mean_e, wh, wd, wpa, wpe, b_out)

    return out_padded[:, :2 * n_ae]


# -----------------------------------------------------------------------------
# Pure-JAX reference (PyTorch semantics: training-mode BN, biased batch var)
# -----------------------------------------------------------------------------
def dist_layer_ref(x, atom_idx, ele_idx, params, *, n_ae, n_de,
                   n_seg_atom, n_seg_ele, eps=1e-5):
    w1, b1, w2, b2, w3, b3, gamma, beta = params
    x = x.astype(jnp.float32)
    x_dist = x[:, 2 * n_ae:]
    h = x @ w1.T + b1
    mu = jnp.mean(h, axis=0, keepdims=True)
    var = jnp.mean((h - mu) ** 2, axis=0, keepdims=True)
    h = jnp.maximum((h - mu) / jnp.sqrt(var + eps) * gamma + beta, 0.0)

    def pool_back(idx, n_seg):
        seg_sum = jax.ops.segment_sum(h, idx, num_segments=n_seg)
        cnt = jax.ops.segment_sum(jnp.ones((h.shape[0], 1), jnp.float32), idx,
                                  num_segments=n_seg)
        seg_mean = seg_sum / jnp.maximum(cnt, 1.0)
        return seg_mean[idx, :]

    h1 = jnp.maximum(
        jnp.concatenate([h, pool_back(atom_idx, n_seg_atom), x_dist], 1) @ w2.T + b2, 0.0)
    h2 = jnp.maximum(
        jnp.concatenate([h, pool_back(ele_idx, n_seg_ele), x_dist], 1) @ w3.T + b3, 0.0)
    return jnp.concatenate([h1, h2], axis=1)


if __name__ == "__main__":
    N = 1024          # rows (edge/pair features)
    n_ae = 8          # n_atom_embed
    n_de = 16         # n_dist_embed
    din = 2 * n_ae + n_de
    n_seg_atom = 10   # number of graphs
    n_seg_ele = 5     # number of element groups

    key = jax.random.PRNGKey(0)
    ks = jax.random.split(key, 10)

    x = jax.random.normal(ks[0], (N, din), dtype=jnp.float32)
    atom_idx = jnp.sort(jax.random.randint(ks[1], (N,), 0, n_seg_atom, dtype=jnp.int32))
    ele_idx = jax.random.randint(ks[2], (N,), 0, n_seg_ele, dtype=jnp.int32)

    def lin_init(k, fan_in, shape):
        bound = 1.0 / jnp.sqrt(fan_in)
        return jax.random.uniform(k, shape, jnp.float32, -bound, bound)

    params = (
        lin_init(ks[3], din, (n_ae, din)), lin_init(ks[4], din, (n_ae,)),   # fc1
        lin_init(ks[5], din, (n_ae, din)), lin_init(ks[6], din, (n_ae,)),   # fc2
        lin_init(ks[7], din, (n_ae, din)), lin_init(ks[8], din, (n_ae,)),   # fc3
        jnp.ones((n_ae,), jnp.float32), jnp.zeros((n_ae,), jnp.float32),    # bn1
    )

    out = dist_layer(x, atom_idx, ele_idx, params, n_ae=n_ae, n_de=n_de,
                     n_seg_atom=n_seg_atom, n_seg_ele=n_seg_ele,
                     block_rows=256)
    out = jax.block_until_ready(out)

    ref = dist_layer_ref(x, atom_idx, ele_idx, params, n_ae=n_ae, n_de=n_de,
                         n_seg_atom=n_seg_atom, n_seg_ele=n_seg_ele)
    assert out.shape == (N, 2 * n_ae)
    assert jnp.allclose(out, ref, rtol=1e-4, atol=1e-4), "mismatch vs reference"
    print("KERNEL_OK")
</pallas_src>

<mosaic_0001>
module attributes {stable_mosaic.version = 11 : i64} {
  func.func @_fc1_stats_kernel(%arg0: i32, %arg1: memref<256x32xf32, #tpu.memory_space<vmem>>, %arg2: memref<32x8xf32, #tpu.memory_space<vmem>>, %arg3: memref<1x8xf32, #tpu.memory_space<vmem>>, %arg4: memref<256x8xf32, #tpu.memory_space<vmem>>, %arg5: memref<1x8xf32, #tpu.memory_space<vmem>>, %arg6: memref<1x8xf32, #tpu.memory_space<vmem>>) attributes {dimension_semantics = [#tpu.dimension_semantics<arbitrary>], iteration_bounds = array<i64: 4>, scalar_prefetch = 0 : i64, scratch_operands = 0 : i64, tpu.core_type = #tpu.core_type<tc>, window_params = [{transform_indices = @transform_0, window_bounds = array<i64: 256, 32>}, {pipeline_mode = #tpu.pipeline_mode<synchronous>, transform_indices = @transform_1, window_bounds = array<i64: 32, 8>}, {pipeline_mode = #tpu.pipeline_mode<synchronous>, transform_indices = @transform_2, window_bounds = array<i64: 1, 8>}, {transform_indices = @transform_3, window_bounds = array<i64: 256, 8>}, {pipeline_mode = #tpu.pipeline_mode<synchronous>, transform_indices = @transform_4, window_bounds = array<i64: 1, 8>}, {pipeline_mode = #tpu.pipeline_mode<synchronous>, transform_indices = @transform_5, window_bounds = array<i64: 1, 8>}]} {
    %c0 = arith.constant 0 : index
    %c0_0 = arith.constant 0 : index
    %0 = vector.load %arg1[%c0, %c0_0] : memref<256x32xf32, #tpu.memory_space<vmem>>, vector<256x32xf32>
    %c0_1 = arith.constant 0 : index
    %c0_2 = arith.constant 0 : index
    %1 = vector.load %arg2[%c0_1, %c0_2] : memref<32x8xf32, #tpu.memory_space<vmem>>, vector<32x8xf32>
    %cst = arith.constant dense<0.000000e+00> : vector<256x8xf32>
    %2 = tpu.matmul %0, %1, %cst {dimension_numbers = #tpu.dot_dimension_numbers<[1], [0], [0], [1], [0, 0, 1, 1], [], []>} : vector<256x32xf32>, vector<32x8xf32>, vector<256x8xf32> -> vector<256x8xf32>
    %c0_3 = arith.constant 0 : index
    %c0_4 = arith.constant 0 : index
    %3 = vector.load %arg3[%c0_3, %c0_4] : memref<1x8xf32, #tpu.memory_space<vmem>>, vector<1x8xf32>
    %4 = vector.broadcast %3 : vector<1x8xf32> to vector<256x8xf32>
    %5 = arith.addf %2, %4 : vector<256x8xf32>
    %c0_5 = arith.constant 0 : index
    %c0_6 = arith.constant 0 : index
    %6 = vector.load %arg4[%c0_5, %c0_6] : memref<256x8xf32, #tpu.memory_space<vmem>>, vector<256x8xf32>
    tpu.vector_store %arg4[%c0_5, %c0_6], %5 {strides = array<i32>} : memref<256x8xf32, #tpu.memory_space<vmem>>, vector<256x8xf32>,
    %cst_7 = arith.constant 1.000000e+00 : f32
    %7 = vector.broadcast %cst_7 : f32 to vector<1x256xf32>
    %cst_8 = arith.constant dense<0.000000e+00> : vector<1x8xf32>
    %8 = tpu.matmul %7, %5, %cst_8 {dimension_numbers = #tpu.dot_dimension_numbers<[1], [0], [0], [1], [0, 0, 1, 1], [], []>} : vector<1x256xf32>, vector<256x8xf32>, vector<1x8xf32> -> vector<1x8xf32>
    %9 = arith.mulf %5, %5 : vector<256x8xf32>
    %cst_9 = arith.constant dense<0.000000e+00> : vector<1x8xf32>
    %10 = tpu.matmul %7, %9, %cst_9 {dimension_numbers = #tpu.dot_dimension_numbers<[1], [0], [0], [1], [0, 0, 1, 1], [], []>} : vector<1x256xf32>, vector<256x8xf32>, vector<1x8xf32> -> vector<1x8xf32>
    %c0_i32 = arith.constant 0 : i32
    %11 = arith.cmpi eq, %arg0, %c0_i32 : i32
    %12 = arith.extui %11 : i1 to i32
    %c0_i32_10 = arith.constant 0 : i32
    %13 = arith.cmpi ne, %12, %c0_i32_10 : i32
    scf.if %13 {
      %cst_19 = arith.constant 0.000000e+00 : f32
      %20 = vector.broadcast %cst_19 : f32 to vector<1x8xf32>
      %c0_20 = arith.constant 0 : index
      %c0_21 = arith.constant 0 : index
      %21 = vector.load %arg5[%c0_20, %c0_21] : memref<1x8xf32, #tpu.memory_space<vmem>>, vector<1x8xf32>
      tpu.vector_store %arg5[%c0_20, %c0_21], %20 {strides = array<i32>} : memref<1x8xf32, #tpu.memory_space<vmem>>, vector<1x8xf32>,
      %cst_22 = arith.constant 0.000000e+00 : f32
      %22 = vector.broadcast %cst_22 : f32 to vector<1x8xf32>
      %c0_23 = arith.constant 0 : index
      %c0_24 = arith.constant 0 : index
      %23 = vector.load %arg6[%c0_23, %c0_24] : memref<1x8xf32, #tpu.memory_space<vmem>>, vector<1x8xf32>
      tpu.vector_store %arg6[%c0_23, %c0_24], %22 {strides = array<i32>} : memref<1x8xf32, #tpu.memory_space<vmem>>, vector<1x8xf32>,
    } else {
    }
    %c0_11 = arith.constant 0 : index
    %c0_12 = arith.constant 0 : index
    %14 = vector.load %arg5[%c0_11, %c0_12] : memref<1x8xf32, #tpu.memory_space<vmem>>, vector<1x8xf32>
    %15 = arith.addf %14, %8 : vector<1x8xf32>
    %c0_13 = arith.constant 0 : index
    %c0_14 = arith.constant 0 : index
    %16 = vector.load %arg5[%c0_13, %c0_14] : memref<1x8xf32, #tpu.memory_space<vmem>>, vector<1x8xf32>
    tpu.vector_store %arg5[%c0_13, %c0_14], %15 {strides = array<i32>} : memref<1x8xf32, #tpu.memory_space<vmem>>, vector<1x8xf32>,
    %c0_15 = arith.constant 0 : index
    %c0_16 = arith.constant 0 : index
    %17 = vector.load %arg6[%c0_15, %c0_16] : memref<1x8xf32, #tpu.memory_space<vmem>>, vector<1x8xf32>
    %18 = arith.addf %17, %10 : vector<1x8xf32>
    %c0_17 = arith.constant 0 : index
    %c0_18 = arith.constant 0 : index
    %19 = vector.load %arg6[%c0_17, %c0_18] : memref<1x8xf32, #tpu.memory_space<vmem>>, vector<1x8xf32>
    tpu.vector_store %arg6[%c0_17, %c0_18], %18 {strides = array<i32>} : memref<1x8xf32, #tpu.memory_space<vmem>>, vector<1x8xf32>,
    return
  }
  func.func @transform_0(%arg0: i32) -> (i32, i32) {
    %c0_i32 = arith.constant 0 : i32
    %c0_i32_0 = arith.constant 0 : i32
    return %arg0, %c0_i32 : i32, i32
  }
  func.func @transform_1(%arg0: i32) -> (i32, i32) {
    %c0_i32 = arith.constant 0 : i32
    %c0_i32_0 = arith.constant 0 : i32
    %c0_i32_1 = arith.constant 0 : i32
    return %c0_i32, %c0_i32_0 : i32, i32
  }
  func.func @transform_2(%arg0: i32) -> (i32, i32) {
    %c0_i32 = arith.constant 0 : i32
    %c0_i32_0 = arith.constant 0 : i32
    %c0_i32_1 = arith.constant 0 : i32
    return %c0_i32, %c0_i32_0 : i32, i32
  }
  func.func @transform_3(%arg0: i32) -> (i32, i32) {
    %c0_i32 = arith.constant 0 : i32
    %c0_i32_0 = arith.constant 0 : i32
    return %arg0, %c0_i32 : i32, i32
  }
  func.func @transform_4(%arg0: i32) -> (i32, i32) {
    %c0_i32 = arith.constant 0 : i32
    %c0_i32_0 = arith.constant 0 : i32
    %c0_i32_1 = arith.constant 0 : i32
    return %c0_i32, %c0_i32_0 : i32, i32
  }
  func.func @transform_5(%arg0: i32) -> (i32, i32) {
    %c0_i32 = arith.constant 0 : i32
    %c0_i32_0 = arith.constant 0 : i32
    %c0_i32_1 = arith.constant 0 : i32
    return %c0_i32, %c0_i32_0 : i32, i32
  }
}

</mosaic_0001>

<bundles_post_ra>
// kernel: tpu_custom_call.1
= control target key start
LH: loop header
LB: loop body
LE: loop exit
PB: predicated region body
PF: predicated region fallthrough
CT: control target
= control target key end

     0   :  { %11 = vsyncpa [#allocation3], 0  ;;  %s1287_s0 = inlined_call_operand.vmem [shape: f32[1024,32], index: 0, kind: input, shape index: {}]   ;;  %s1288_s1 = inlined_call_operand.vmem [shape: f32[32,8], index: 1, kind: input, shape index: {}]   ;;  %s1289_s2 = inlined_call_operand.vmem [shape: f32[1,8], index: 2, kind: input, shape index: {}]   ;;  %s1290_s3 = inlined_call_operand.vmem [shape: f32[1024,8], index: 3, kind: output, shape index: {0}]   ;;  %s1291_s4 = inlined_call_operand.hbm [shape: f32[1,8], index: 4, kind: output, shape index: {1}]   ;;  %s1292_s5 = inlined_call_operand.hbm [shape: f32[1,8], index: 5, kind: output, shape index: {2}]  }
   0x1   :  { %12 = vsyncpa [#allocation5], 0  ;;  %s927_s18 = smov 0  }
   0x2 LB: > { %s933_s19 = sadd.s32 4294967295, %s891_s18   ;;  %p744_p0 = scmp.ge.s32.totalorder %s891_s18, 1  ;;  %s891_s18 = sphi %s927_s18, %s18_s18  }
   0x3   : > { %p185_p1 = scmp.lt.s32.totalorder %s891_s18, 5 }
   0x5   : > { %p186_p2 = pnand %p744_p0, %p185_p1 }
   0x6   : > { %s745_s24 = sshll.u32 (!%p186_p2), %s933_s19, 5  ;;  %p781_p4 = scmp.ne.s32.totalorder (!%p186_p2), %s933_s19, 0 }
   0x7   : > { %189 = sbr.rel (%p186_p2) target bundleno = 436 (0x1b4), region = 32  ;;  %p214_p3 = scmp.lt.s32.totalorder (!%p186_p2), %s745_s24, 127 }
   0xc   : > { %v260_v0 = vld [vmem:[%s1288_s1 + $0x18] sm:$0xff]  ;;  %v259_v1 = vld [vmem:[%s1288_s1 + $0x10] sm:$0xff]  ;;  %v258_v2 = vld [vmem:[%s1288_s1 + $0x8] sm:$0xff]  ;;  %s1294_s24 = smov (!%p214_p3, %s745_s24), 127  ;;  %vm265_vm0 = vcmask 261120   ;;  %vm475_vm1 = vcmask 64512  }
   0xd   : > { %374 = vmatpush.msra.mxu0 %v260_v0  ;;  %789 = vmatpush.msra.mxu3 %v260_v0  ;;  %v257_v3 = vld [vmem:[%s1288_s1] sm:$0xff]  ;;  %s746_s29 = sshll.u32 %s1294_s24, 3 }
   0xe   : > { %788 = vmatpush.msra.mxu2 %v260_v0  ;;  %s958_s7 = scalar_lea.vmem %s1287_s0, %s746_s29  ;;  %v1027_v36 = vld [vmem:[%s1289_s2] ss:$0 sm:$0xff]  ;;  %s1034_s12 = scalar_lea.vmem %s1290_s3, %s746_s29 }
   0xf   : > { %375 = vmatpush.msra.mxu0 %v259_v1  ;;  %791 = vmatpush.msra.mxu3 %v259_v1  ;;  %v225_v4 = vld [vmem:[%s958_s7] sm:$0xff]  ;;  %v247_v5 = vld [vmem:[%s958_s7 + $0xb0] sm:$0xff]  ;;  %v226_v7 = vld [vmem:[%s958_s7 + $0x8] sm:$0xff] }
  0x10   : > { %790 = vmatpush.msra.mxu2 %v259_v1  ;;  %v237_v6 = vld [vmem:[%s958_s7 + $0x60] sm:$0xff]  ;;  %v248_v8 = vld [vmem:[%s958_s7 + $0xb8] sm:$0xff]  ;;  %v238_v9 = vld [vmem:[%s958_s7 + $0x68] sm:$0xff] }
  0x11   : > { %376 = vmatpush.msra.mxu0 %v258_v2  ;;  %793 = vmatpush.msra.mxu3 %v258_v2  ;;  %v227_v10 = vld [vmem:[%s958_s7 + $0x10] sm:$0xff]  ;;  %v249_v11 = vld [vmem:[%s958_s7 + $0xc0] sm:$0xff]  ;;  %v228_v13 = vld [vmem:[%s958_s7 + $0x18] sm:$0xff] }
  0x12   : > { %792 = vmatpush.msra.mxu2 %v258_v2  ;;  %v239_v12 = vld [vmem:[%s958_s7 + $0x70] sm:$0xff]  ;;  %v250_v14 = vld [vmem:[%s958_s7 + $0xc8] sm:$0xff]  ;;  %v240_v15 = vld [vmem:[%s958_s7 + $0x78] sm:$0xff] }
  0x13   : > { %377 = vmatpush.msra.mxu0 %v257_v3  ;;  %795 = vmatpush.msra.mxu3 %v257_v3  ;;  %v229_v16 = vld [vmem:[%s958_s7 + $0x20] sm:$0xff]  ;;  %v251_v17 = vld [vmem:[%s958_s7 + $0xd0] sm:$0xff]  ;;  %v230_v19 = vld [vmem:[%s958_s7 + $0x28] sm:$0xff] }
  0x14   : > { %749 = vmatmul.msk.f32.vlgmr.msra.gmra.mxu0 %vm265_vm0, %v225_v4  ;;  %771 = vmatmul.msk.f32.vlgmr.msra.gmra.mxu3 %vm265_vm0, %v247_v5  ;;  %v241_v18 = vld [vmem:[%s958_s7 + $0x80] sm:$0xff]  ;;  %v252_v20 = vld [vmem:[%s958_s7 + $0xd8] sm:$0xff]  ;;  %v242_v21 = vld [vmem:[%s958_s7 + $0x88] sm:$0xff] }
  0x15   : > { %794 = vmatpush.msra.mxu2 %v257_v3  ;;  %v231_v22 = vld [vmem:[%s958_s7 + $0x30] sm:$0xff]  ;;  %v253_v23 = vld [vmem:[%s958_s7 + $0xe0] sm:$0xff]  ;;  %v232_v25 = vld [vmem:[%s958_s7 + $0x38] sm:$0xff] }
  0x16   : > { %761 = vmatmul.msk.f32.vlgmr.msra.gmra.mxu2 %vm265_vm0, %v237_v6  ;;  %v243_v24 = vld [vmem:[%s958_s7 + $0x90] sm:$0xff]  ;;  %v254_v26 = vld [vmem:[%s958_s7 + $0xe8] sm:$0xff]  ;;  %v244_v27 = vld [vmem:[%s958_s7 + $0x98] sm:$0xff] }
  0x17   : > { %v233_v28 = vld [vmem:[%s958_s7 + $0x40] sm:$0xff]  ;;  %v255_v29 = vld [vmem:[%s958_s7 + $0xf0] sm:$0xff]  ;;  %v234_v31 = vld [vmem:[%s958_s7 + $0x48] sm:$0xff] }
  0x18   : > { %v245_v30 = vld [vmem:[%s958_s7 + $0xa0] sm:$0xff]  ;;  %v256_v32 = vld [vmem:[%s958_s7 + $0xf8] sm:$0xff]  ;;  %v246_v33 = vld [vmem:[%s958_s7 + $0xa8] sm:$0xff] }
  0x19   : > { %v235_v34 = vld [vmem:[%s958_s7 + $0x50] sm:$0xff]  ;;  %v236_v35 = vld [vmem:[%s958_s7 + $0x58] sm:$0xff] }
  0x1c   : > { %750 = vmatmul.msk.f32.gmra.mxu0 %vm265_vm0, %v226_v7  ;;  %772 = vmatmul.msk.f32.gmra.mxu3 %vm265_vm0, %v248_v8 }
  0x1e   : > { %762 = vmatmul.msk.f32.gmra.mxu2 %vm265_vm0, %v238_v9 }
  0x24   : > { %751 = vmatmul.msk.f32.gmra.mxu0 %vm265_vm0, %v227_v10  ;;  %773 = vmatmul.msk.f32.gmra.mxu3 %vm265_vm0, %v249_v11 }
  0x26   : > { %763 = vmatmul.msk.f32.gmra.mxu2 %vm265_vm0, %v239_v12 }
  0x2c   : > { %752 = vmatmul.msk.f32.gmra.mxu0 %vm265_vm0, %v228_v13  ;;  %774 = vmatmul.msk.f32.gmra.mxu3 %vm265_vm0, %v250_v14 }
  0x2e   : > { %764 = vmatmul.msk.f32.gmra.mxu2 %vm265_vm0, %v240_v15 }
  0x34   : > { %753 = vmatmul.msk.f32.gmra.mxu0 %vm265_vm0, %v229_v16  ;;  %775 = vmatmul.msk.f32.gmra.mxu3 %vm265_vm0, %v251_v17 }
  0x36   : > { %765 = vmatmul.msk.f32.gmra.mxu2 %vm265_vm0, %v241_v18 }
  0x3c   : > { %754 = vmatmul.msk.f32.gmra.mxu0 %vm265_vm0, %v230_v19  ;;  %776 = vmatmul.msk.f32.gmra.mxu3 %vm265_vm0, %v252_v20 }
  0x3e   : > { %766 = vmatmul.msk.f32.gmra.mxu2 %vm265_vm0, %v242_v21 }
  0x44   : > { %755 = vmatmul.msk.f32.gmra.mxu0 %vm265_vm0, %v231_v22  ;;  %777 = vmatmul.msk.f32.gmra.mxu3 %vm265_vm0, %v253_v23 }
  0x46   : > { %767 = vmatmul.msk.f32.gmra.mxu2 %vm265_vm0, %v243_v24 }
  0x4c   : > { %756 = vmatmul.msk.f32.gmra.mxu0 %vm265_vm0, %v232_v25  ;;  %778 = vmatmul.msk.f32.gmra.mxu3 %vm265_vm0, %v254_v26 }
  0x4e   : > { %768 = vmatmul.msk.f32.gmra.mxu2 %vm265_vm0, %v244_v27 }
  0x54   : > { %757 = vmatmul.msk.f32.gmra.mxu0 %vm265_vm0, %v233_v28  ;;  %779 = vmatmul.msk.f32.gmra.mxu3 %vm265_vm0, %v255_v29 }
  0x56   : > { %769 = vmatmul.msk.f32.gmra.mxu2 %vm265_vm0, %v245_v30 }
  0x5c   : > { %758 = vmatmul.msk.f32.gmra.mxu0 %vm265_vm0, %v234_v31  ;;  %780 = vmatmul.msk.f32.gmra.mxu3 %vm265_vm0, %v256_v32 }
  0x5e   : > { %770 = vmatmul.msk.f32.gmra.mxu2 %vm265_vm0, %v246_v33 }
  0x64   : > { %759 = vmatmul.msk.f32.gmra.mxu0 %vm265_vm0, %v235_v34 }
  0x6c   : > { %760 = vmatmul.msk.f32.gmra.mxu0 %vm265_vm0, %v236_v35 }
  0x91   : > { %v379_v37 = vpop.f32.mrf.mxu0 }
  0x92   : > { %v1037_v38 = vadd.f32 %v1027_v36, %v379_v37 }
  0x94   : > { %476 = vst.msk [vmem:[%s1034_s12] sm:$0xff] %vm475_vm1, %v1037_v38 }
  0x97   : > { %v445_v39 = vpop.f32.mrf.mxu3 }
  0x98   : > { %v1043_v40 = vadd.f32 %v1027_v36, %v445_v39 }
  0x99   : > { %v382_v41 = vpop.f32.mrf.mxu0  ;;  %v415_v42 = vpop.f32.mrf.mxu2 }
  0x9a   : > { %498 = vst.msk [vmem:[%s1034_s12 + $0xb0] sm:$0xff] %vm475_vm1, %v1043_v40  ;;  %v1049_v43 = vadd.f32 %v1027_v36, %v382_v41  ;;  %v416_v44 = vadd.f32 %v1027_v36, %v415_v42 }
  0x9c   : > { %477 = vst.msk [vmem:[%s1034_s12 + $0x8] sm:$0xff] %vm475_vm1, %v1049_v43  ;;  %v560_v4 = vmul.f32 %v416_v44, %v416_v44 }
  0x9d   : > { %488 = vst.msk [vmem:[%s1034_s12 + $0x60] sm:$0xff] %vm475_vm1, %v416_v44 }
  0x9f   : > { %v448_v45 = vpop.f32.mrf.mxu3 }
  0xa0   : > { %v1058_v46 = vadd.f32 %v1027_v36, %v448_v45 }
  0xa1   : > { %v385_v47 = vpop.f32.mrf.mxu0  ;;  %v418_v48 = vpop.f32.mrf.mxu2 }
  0xa2   : > { %499 = vst.msk [vmem:[%s1034_s12 + $0xb8] sm:$0xff] %vm475_vm1, %v1058_v46  ;;  %v1064_v49 = vadd.f32 %v1027_v36, %v385_v47  ;;  %v419_v50 = vadd.f32 %v1027_v36, %v418_v48 }
  0xa4   : > { %478 = vst.msk [vmem:[%s1034_s12 + $0x10] sm:$0xff] %vm475_vm1, %v1064_v49  ;;  %v561_v1 = vmul.f32 %v419_v50, %v419_v50 }
  0xa5   : > { %489 = vst.msk [vmem:[%s1034_s12 + $0x68] sm:$0xff] %vm475_vm1, %v419_v50 }
  0xa7   : > { %v451_v51 = vpop.f32.mrf.mxu3 }
  0xa8   : > { %v1073_v52 = vadd.f32 %v1027_v36, %v451_v51 }
  0xa9   : > { %v388_v53 = vpop.f32.mrf.mxu0  ;;  %v421_v54 = vpop.f32.mrf.mxu2 }
  0xaa   : > { %500 = vst.msk [vmem:[%s1034_s12 + $0xc0] sm:$0xff] %vm475_vm1, %v1073_v52  ;;  %v1079_v55 = vadd.f32 %v1027_v36, %v388_v53  ;;  %v422_v56 = vadd.f32 %v1027_v36, %v421_v54 }
  0xac   : > { %479 = vst.msk [vmem:[%s1034_s12 + $0x18] sm:$0xff] %vm475_vm1, %v1079_v55  ;;  %v562_v0 = vmul.f32 %v422_v56, %v422_v56 }
  0xad   : > { %490 = vst.msk [vmem:[%s1034_s12 + $0x70] sm:$0xff] %vm475_vm1, %v422_v56 }
  0xaf   : > { %v454_v57 = vpop.f32.mrf.mxu3 }
  0xb0   : > { %v1088_v58 = vadd.f32 %v1027_v36, %v454_v57  ;;  %v550_v57 = vmul.f32 %v1064_v49, %v1064_v49 }
  0xb1   : > { %v391_v59 = vpop.f32.mrf.mxu0  ;;  %v424_v60 = vpop.f32.mrf.mxu2 }
  0xb2   : > { %501 = vst.msk [vmem:[%s1034_s12 + $0xc8] sm:$0xff] %vm475_vm1, %v1088_v58  ;;  %v1094_v61 = vadd.f32 %v1027_v36, %v391_v59  ;;  %v425_v62 = vadd.f32 %v1027_v36, %v424_v60  ;;  %v549_v59 = vmul.f32 %v1049_v43, %v1049_v43 }
  0xb4   : > { %480 = vst.msk [vmem:[%s1034_s12 + $0x20] sm:$0xff] %vm475_vm1, %v1094_v61  ;;  %508 = vmatpush.msra.mxu1 %v425_v62  ;;  %v563_v63 = vmul.f32 %v425_v62, %v425_v62  ;;  %v552_v54 = vmul.f32 %v1094_v61, %v1094_v61 }
  0xb5   : > { %491 = vst.msk [vmem:[%s1034_s12 + $0x78] sm:$0xff] %vm475_vm1, %v425_v62 }
  0xb6   : > { %509 = vmatpush.msra.mxu1 %v422_v56  ;;  %580 = vmatpush.msrb.mxu3 %v563_v63  ;;  %v551_v56 = vmul.f32 %v1079_v55, %v1079_v55 }
  0xb7   : > { %v457_v2 = vpop.f32.mrf.mxu3 }
  0xb8   : > { %v1103_v3 = vadd.f32 %v1027_v36, %v457_v2  ;;  %510 = vmatpush.msra.mxu1 %v419_v50  ;;  %581 = vmatpush.msrb.mxu3 %v562_v0  ;;  %v573_v0 = vmul.f32 %v1088_v58, %v1088_v58  ;;  %v571_v2 = vmul.f32 %v1058_v46, %v1058_v46 }
  0xb9   : > { %v394_v5 = vpop.f32.mrf.mxu0  ;;  %v427_v6 = vpop.f32.mrf.mxu2 }
  0xba   : > { %502 = vst.msk [vmem:[%s1034_s12 + $0xd0] sm:$0xff] %vm475_vm1, %v1103_v3  ;;  %v1109_v7 = vadd.f32 %v1027_v36, %v394_v5  ;;  %511 = vmatpush.msra.mxu1 %v416_v44  ;;  %582 = vmatpush.msrb.mxu3 %v561_v1  ;;  %v1112_v8 = vadd.f32 %v1027_v36, %v427_v6 }
  0xbb   : > { %v572_v1 = vmul.f32 %v1073_v52, %v1073_v52 }
  0xbc   : > { %481 = vst.msk [vmem:[%s1034_s12 + $0x28] sm:$0xff] %vm475_vm1, %v1109_v7  ;;  %583 = vmatpush.msrb.mxu3 %v560_v4  ;;  %v553_v53 = vmul.f32 %v1109_v7, %v1109_v7  ;;  %v570_v4 = vmul.f32 %v1043_v40, %v1043_v40  ;;  %v564_v5 = vmul.f32 %v1112_v8, %v1112_v8 }
  0xbd   : > { %492 = vst.msk [vmem:[%s1034_s12 + $0x80] sm:$0xff] %vm475_vm1, %v1112_v8 }
  0xbf   : > { %v460_v9 = vpop.f32.mrf.mxu3 }
  0xc0   : > { %v1121_v10 = vadd.f32 %v1027_v36, %v460_v9 }
  0xc1   : > { %v397_v11 = vpop.f32.mrf.mxu0  ;;  %v430_v12 = vpop.f32.mrf.mxu2 }
  0xc2   : > { %503 = vst.msk [vmem:[%s1034_s12 + $0xd8] sm:$0xff] %vm475_vm1, %v1121_v10  ;;  %v1127_v13 = vadd.f32 %v1027_v36, %v397_v11  ;;  %v1130_v14 = vadd.f32 %v1027_v36, %v430_v12  ;;  %v575_v63 = vmul.f32 %v1121_v10, %v1121_v10 }
  0xc4   : > { %482 = vst.msk [vmem:[%s1034_s12 + $0x30] sm:$0xff] %vm475_vm1, %v1127_v13  ;;  %v554_v51 = vmul.f32 %v1127_v13, %v1127_v13 }
  0xc5   : > { %493 = vst.msk [vmem:[%s1034_s12 + $0x88] sm:$0xff] %vm475_vm1, %v1130_v14 }
  0xc7   : > { %v463_v15 = vpop.f32.mrf.mxu3 }
  0xc8   : > { %v1139_v16 = vadd.f32 %v1027_v36, %v463_v15 }
  0xc9   : > { %v400_v17 = vpop.f32.mrf.mxu0  ;;  %v433_v18 = vpop.f32.mrf.mxu2 }
  0xca   : > { %504 = vst.msk [vmem:[%s1034_s12 + $0xe0] sm:$0xff] %vm475_vm1, %v1139_v16  ;;  %v401_v19 = vadd.f32 %v1027_v36, %v400_v17  ;;  %v1146_v20 = vadd.f32 %v1027_v36, %v433_v18 }
  0xcc   : > { %483 = vst.msk [vmem:[%s1034_s12 + $0x38] sm:$0xff] %vm475_vm1, %v401_v19  ;;  %v555_v50 = vmul.f32 %v401_v19, %v401_v19 }
  0xcd   : > { %494 = vst.msk [vmem:[%s1034_s12 + $0x90] sm:$0xff] %vm475_vm1, %v1146_v20 }
  0xcf   : > { %v466_v21 = vpop.f32.mrf.mxu3 }
  0xd0   : > { %v1154_v22 = vadd.f32 %v1027_v36, %v466_v21 }
  0xd1   : > { %v403_v23 = vpop.f32.mrf.mxu0  ;;  %v436_v24 = vpop.f32.mrf.mxu2 }
  0xd2   : > { %505 = vst.msk [vmem:[%s1034_s12 + $0xe8] sm:$0xff] %vm475_vm1, %v1154_v22  ;;  %v404_v25 = vadd.f32 %v1027_v36, %v403_v23  ;;  %v1161_v26 = vadd.f32 %v1027_v36, %v436_v24  ;;  %v577_v62 = vmul.f32 %v1154_v22, %v1154_v22 }
  0xd4   : > { %484 = vst.msk [vmem:[%s1034_s12 + $0x40] sm:$0xff] %vm475_vm1, %v404_v25 }
  0xd5   : > { %495 = vst.msk [vmem:[%s1034_s12 + $0x98] sm:$0xff] %vm475_vm1, %v1161_v26 }
  0xd7   : > { %v469_v27 = vpop.f32.mrf.mxu3 }
  0xd8   : > { %v1169_v28 = vadd.f32 %v1027_v36, %v469_v27 }
  0xd9   : > { %v406_v29 = vpop.f32.mrf.mxu0  ;;  %v439_v30 = vpop.f32.mrf.mxu2 }
  0xda   : > { %506 = vst.msk [vmem:[%s1034_s12 + $0xf0] sm:$0xff] %vm475_vm1, %v1169_v28  ;;  %v407_v31 = vadd.f32 %v1027_v36, %v406_v29  ;;  %v1176_v32 = vadd.f32 %v1027_v36, %v439_v30 }
  0xdc   : > { %485 = vst.msk [vmem:[%s1034_s12 + $0x48] sm:$0xff] %vm475_vm1, %v407_v31  ;;  %v557_v48 = vmul.f32 %v407_v31, %v407_v31 }
  0xdd   : > { %496 = vst.msk [vmem:[%s1034_s12 + $0xa0] sm:$0xff] %vm475_vm1, %v1176_v32 }
  0xdf   : > { %v472_v33 = vpop.f32.mrf.mxu3 }
  0xe0   : > { %v473_v34 = vadd.f32 %v1027_v36, %v472_v33 }
  0xe1   : > { %v409_v35 = vpop.f32.mrf.mxu0  ;;  %v442_v37 = vpop.f32.mrf.mxu2 }
  0xe2   : > { %507 = vst.msk [vmem:[%s1034_s12 + $0xf8] sm:$0xff] %vm475_vm1, %v473_v34  ;;  %v410_v39 = vadd.f32 %v1027_v36, %v409_v35  ;;  %528 = vmatpush.msrb.mxu2 %v473_v34  ;;  %v1188_v41 = vadd.f32 %v1027_v36, %v442_v37  ;;  %v579_v60 = vmul.f32 %v473_v34, %v473_v34 }
  0xe4   : > { %486 = vst.msk [vmem:[%s1034_s12 + $0x50] sm:$0xff] %vm475_vm1, %v410_v39  ;;  %529 = vmatpush.msrb.mxu2 %v1169_v28  ;;  %v558_v47 = vmul.f32 %v410_v39, %v410_v39 }
  0xe5   : > { %497 = vst.msk [vmem:[%s1034_s12 + $0xa8] sm:$0xff] %vm475_vm1, %v1188_v41 }
  0xe6   : > { %530 = vmatpush.msrb.mxu2 %v1154_v22 }
  0xe8   : > { %531 = vmatpush.msrb.mxu2 %v1139_v16 }
  0xe9   : > { %v412_v42 = vpop.f32.mrf.mxu0 }
  0xea   : > { %v413_v44 = vadd.f32 %v1027_v36, %v412_v42  ;;  %532 = vmatpush.msrb.mxu2 %v1121_v10  ;;  %v556_v36 = vmul.f32 %v404_v25, %v404_v25 }
  0xec   : > { %487 = vst.msk [vmem:[%s1034_s12 + $0x58] sm:$0xff] %vm475_vm1, %v413_v44  ;;  %512 = vmatpush.msra.mxu1 %v413_v44  ;;  %533 = vmatpush.msrb.mxu2 %v1103_v3  ;;  %v559_v45 = vmul.f32 %v413_v44, %v413_v44 }
  0xee   : > { %513 = vmatpush.msra.mxu1 %v410_v39  ;;  %534 = vmatpush.msrb.mxu2 %v1088_v58  ;;  %v568_v58 = vmul.f32 %v1176_v32, %v1176_v32 }
  0xef   : > { %584 = vmatpush.msrb.mxu3 %v559_v45 }
  0xf0   : > { %514 = vmatpush.msra.mxu1 %v407_v31  ;;  %535 = vmatpush.msrb.mxu2 %v1073_v52  ;;  %v567_v52 = vmul.f32 %v1161_v26, %v1161_v26 }
  0xf1   : > { %585 = vmatpush.msrb.mxu3 %v558_v47 }
  0xf2   : > { %515 = vmatpush.msra.mxu1 %v404_v25  ;;  %536 = vmatpush.msrb.mxu2 %v1058_v46  ;;  %v566_v46 = vmul.f32 %v1146_v20, %v1146_v20 }
  0xf3   : > { %586 = vmatpush.msrb.mxu3 %v557_v48 }
  0xf4   : > { %516 = vmatpush.msra.mxu1 %v401_v19  ;;  %537 = vmatpush.msrb.mxu2 %v1043_v40  ;;  %v565_v40 = vmul.f32 %v1130_v14, %v1130_v14 }
  0xf5   : > { %587 = vmatpush.msrb.mxu3 %v556_v36 }
  0xf6   : > { %517 = vmatpush.msra.mxu1 %v1127_v13  ;;  %538 = vmatpush.msrb.mxu2 %v1188_v41 }
  0xf7   : > { %588 = vmatpush.msrb.mxu3 %v555_v50 }
  0xf8   : > { %518 = vmatpush.msra.mxu1 %v1109_v7  ;;  %539 = vmatpush.msrb.mxu2 %v1176_v32 }
  0xf9   : > { %589 = vmatpush.msrb.mxu3 %v554_v51 }
  0xfa   : > { %519 = vmatpush.msra.mxu1 %v1094_v61  ;;  %540 = vmatpush.msrb.mxu2 %v1161_v26  ;;  %v893_v61 = vmov 1.0  }
  0xfb   : > { %590 = vmatpush.msrb.mxu3 %v553_v53 }
  0xfc   : > { %520 = vmatpush.msra.mxu1 %v1079_v55  ;;  %541 = vmatpush.msrb.mxu2 %v1146_v20  ;;  %v548_v55 = vmul.f32 %v1037_v38, %v1037_v38 }
  0xfd   : > { %591 = vmatpush.msrb.mxu3 %v552_v54 }
  0xfe   : > { %521 = vmatpush.msra.mxu1 %v1064_v49  ;;  %542 = vmatpush.msrb.mxu2 %v1130_v14  ;;  %v578_v49 = vmul.f32 %v1169_v28, %v1169_v28 }
  0xff   : > { %592 = vmatpush.msrb.mxu3 %v551_v56 }
 0x100   : > { %522 = vmatpush.msra.mxu1 %v1049_v43  ;;  %543 = vmatpush.msrb.mxu2 %v1112_v8  ;;  %v576_v43 = vmul.f32 %v1139_v16, %v1139_v16 }
 0x101   : > { %593 = vmatpush.msrb.mxu3 %v550_v57  ;;  %544 = vmatmul.f32.vlgmr.msrb.gmra.mxu2 %v893_v61 }
 0x102   : > { %523 = vmatpush.msra.mxu1 %v1037_v38  ;;  %v574_v38 = vmul.f32 %v1103_v3, %v1103_v3  ;;  %v569_v3 = vmul.f32 %v1188_v41, %v1188_v41 }
 0x103   : > { %594 = vmatpush.msrb.mxu3 %v549_v59  ;;  %524 = vmatmul.f32.vlgmr.msra.gmra.mxu1 %v893_v61 }
 0x104   : > { %600 = vmatpush.msrb.mxu1 %v579_v60 }
 0x105   : > { %595 = vmatpush.msrb.mxu3 %v548_v55 }
 0x106   : > { %601 = vmatpush.msrb.mxu1 %v578_v49  ;;  %596 = vmatmul.f32.vlgmr.msrb.gmra.mxu3 %v893_v61 }
 0x108   : > { %602 = vmatpush.msrb.mxu1 %v577_v62 }
 0x10a   : > { %603 = vmatpush.msrb.mxu1 %v576_v43 }
 0x10c   : > { %604 = vmatpush.msrb.mxu1 %v575_v63 }
 0x10e   : > { %605 = vmatpush.msrb.mxu1 %v574_v38 }
 0x110   : > { %606 = vmatpush.msrb.mxu1 %v573_v0 }
 0x112   : > { %607 = vmatpush.msrb.mxu1 %v572_v1 }
 0x114   : > { %608 = vmatpush.msrb.mxu1 %v571_v2 }
 0x116   : > { %609 = vmatpush.msrb.mxu1 %v570_v4 }
 0x118   : > { %610 = vmatpush.msrb.mxu1 %v569_v3 }
 0x11a   : > { %611 = vmatpush.msrb.mxu1 %v568_v58 }
 0x11c   : > { %612 = vmatpush.msrb.mxu1 %v567_v52 }
 0x11e   : > { %613 = vmatpush.msrb.mxu1 %v566_v46 }
 0x120   : > { %614 = vmatpush.msrb.mxu1 %v565_v40 }
 0x122   : > { %615 = vmatpush.msrb.mxu1 %v564_v5 }
 0x123   : > { %616 = vmatmul.f32.vlgmr.msrb.gmra.mxu1 %v893_v61 }
 0x180   : > { %v525_v6 = vpop.f32.mrf.mxu1 }
 0x184   : > { %v545_v7 = vpop.f32.mrf.mxu2 }
 0x185   : > { %v546_v9 = vadd.f32 %v545_v7, %v525_v6 }
 0x189   : > { %v597_v10 = vpop.f32.mrf.mxu3 }
 0x19d   : > { %623 = sbr.rel (%p781_p4) target bundleno = 421 (0x1a5), region = 36 }
 0x1a0   : > { %v617_v11 = vpop.f32.mrf.mxu1 }
 0x1a1   : > { %v618_v12 = vadd.f32 %v617_v11, %v597_v10 }
 0x1a2   : > { %vm624_vm2 = vcmask 57344   ;;  %v894_v13 = vmov 0.0  }
 0x1a3   : > { %625 = vst.msk [vmem:[#allocation2] sm:$0x1] %vm624_vm2, %v894_v13 }
 0x1a4   : > { %626 = vst.msk [vmem:[#allocation4] sm:$0x1] %vm624_vm2, %v894_v13 }
 0x1a5 PF: > { %vm629_vm3 = vcmask 57344   ;;  %p804_p5 = scmp.eq.s32.totalorder %s933_s19, 3  ;;  %s895_s13 = smov [#allocation2]  }
 0x1a6   : > { %s649_s14 = sshll.u32 %s895_s13, 4  ;;  %s651_s17 = sshll.u32 %s1291_s4, 4  ;;  %s650_s14 = int_to_ptr.vmem [resolvable:$true] %s649_s14  ;;  %s652_s17 = int_to_ptr.hbm [resolvable:$true] %s651_s17 }
 0x1a7   : > { %s663_s22 = sshll.u32 %s1292_s5, 4  ;;  %s896_s23 = smov [#allocation4]   ;;  %s664_s22 = int_to_ptr.hbm [resolvable:$true] %s663_s22 }
 0x1a8   : > { %s661_s24 = sshll.u32 %s896_s23, 4  ;;  %s662_s24 = int_to_ptr.vmem [resolvable:$true] %s661_s24 }
 0x1aa   : > { %v627_v14 = vld [vmem:[#allocation2] sm:$0x1] }
 0x1ab   : > { %v631_v8 = vld [vmem:[#allocation4] sm:$0x1]  ;;  %v628_v15 = vadd.f32 %v627_v14, %v546_v9 }
 0x1ac   : > { %v632_v16 = vadd.f32 %v631_v8, %v618_v12 }
 0x1ad   : > { %630 = vst.msk [vmem:[#allocation2] sm:$0x1] %vm629_vm3, %v628_v15 }
 0x1ae   : > { %633 = vst.msk [vmem:[#allocation4] sm:$0x1] %vm629_vm3, %v632_v16  ;;  %797 = dma.vmem_to_hbm [thread:$0]  (%p804_p5), %s650_s14, 16, %s652_s17, [#allocation3]  }
 0x1af   : > { %799 = dma.vmem_to_hbm [thread:$0]  (%p804_p5), %s662_s24, 16, %s664_s22, [#allocation5]  }
 0x1b0   : > { %882 = dma.done.wait (%p804_p5), [#allocation3], 16  }
 0x1b1   : > { %884 = vsyncadd (%p804_p5), [#allocation3], 4294967280 }
 0x1b2   : > { %886 = dma.done.wait (%p804_p5), [#allocation5], 16  }
 0x1b3   : > { %888 = vsyncadd (%p804_p5), [#allocation5], 4294967280 }
 0x1b4 PF: > { %s18_s18 = sadd.s32 1, %s891_s18  }
 0x1b5   : > { %p15_p6 = scmp.ge.s32.totalorder %s18_s18, 6  }
 0x1b7   :  { %17 = sbr.rel (!%p15_p6) target bundleno = 2 (0x2), region = 83 }
 0x1bc   :  { %690 = vsyncpa [#allocation3], 1 }
 0x1bd   :  { %692 = vsyncpa [#allocation3 + $0x1], 1 }
 0x1be   :  { %693 = vsyncpa [#allocation5], 1 }

</bundles_post_ra>
